<compile_context>
chip_gen: v7x
topology: tpu7x:2x2x1
jax: 0.10.0
libtpu: 0.0.40
codegen_flags: <defaults>
</compile_context>

<pallas_src>
import jax
import jax.numpy as jnp
from jax.experimental import pallas as pl
from jax.experimental.pallas import tpu as pltpu


_TINY_BYTES = 256 * 1024          # below this, a Pallas launch costs more than the copy
_MAX_LANE_WIDTH = 8192            # widest lane-dense row we bother with (32 KiB @ f32)


# ----------------------------------------------------------------------------
# Kernels
# ----------------------------------------------------------------------------
def _copy_kernel(w_ref, o_ref):
    # Whole-tile VMEM copy: HBM->VMEM (auto DMA) -> vld/vst -> VMEM->HBM (auto DMA).
    o_ref[...] = w_ref[...]


def _hbm_copy_kernel(w_hbm, o_hbm, sem):
    # Direct HBM->HBM DMA: no VMEM staging, no TensorCore vector work.
    cp = pltpu.make_async_copy(w_hbm, o_hbm, sem)
    cp.start()
    cp.wait()


# ----------------------------------------------------------------------------
# Helpers
# ----------------------------------------------------------------------------
def _tile_bytes_for_chip():
    """Per-generation tile cap: smaller on v7x (64 MiB physical VMEM)."""
    try:
        info = pltpu.get_tpu_info()
        vmem = int(getattr(info, "vmem_capacity_bytes", 0) or 0)
    except Exception:
        vmem = 0
    if vmem and vmem <= (64 << 20):      # v7x-class: 64 MiB VMEM per TC
        return 4 << 20
    return 8 << 20                        # v5e / v6e: 128 MiB VMEM


def _choose_lane_width(total, max_lane=_MAX_LANE_WIDTH):
    """Largest multiple of 128 (<= max_lane) that divides `total`."""
    best = 128
    cap = min(max_lane, total)
    lane = 128
    while lane <= cap:
        if total % lane == 0:
            best = lane
        lane += 128
    return best


def _tiled_copy(x, *, max_tile_bytes=None):
    """Row-tiled, grid-parallel VMEM copy of a 2-D array (lane-dense caller)."""
    R, C = x.shape
    itemsize = jnp.dtype(x.dtype).itemsize
    if max_tile_bytes is None:
        max_tile_bytes = _tile_bytes_for_chip()

    bytes_per_row = C * itemsize
    # Rows per tile: multiple of 8 so non-final blocks satisfy the (8, 128) rule.
    rows_fit = max(8, (max_tile_bytes // max(bytes_per_row, 1)) // 8 * 8)
    tile_r = R if R <= rows_fit else rows_fit

    tile_bytes = tile_r * bytes_per_row
    # in + out, double-buffered each, plus headroom; keep under v7x's 64 MiB physical.
    vmem_limit = int(min(4 * tile_bytes + (4 << 20), 48 << 20))
    nbytes = R * C * itemsize

    grid = (pl.cdiv(R, tile_r),)
    return pl.pallas_call(
        _copy_kernel,
        out_shape=jax.ShapeDtypeStruct((R, C), x.dtype),
        grid=grid,
        in_specs=[pl.BlockSpec((tile_r, C), lambda i: (i, 0))],
        out_specs=pl.BlockSpec((tile_r, C), lambda i: (i, 0)),
        compiler_params=pltpu.CompilerParams(
            dimension_semantics=("parallel",),
            vmem_limit_bytes=vmem_limit,
        ),
        cost_estimate=pl.CostEstimate(
            flops=0, transcendentals=0, bytes_accessed=2 * nbytes),
    )(x)


def _hbm_to_hbm_copy(x):
    """Single-descriptor HBM->HBM DMA copy (no VMEM round trip)."""
    nbytes = x.size * jnp.dtype(x.dtype).itemsize
    return pl.pallas_call(
        _hbm_copy_kernel,
        out_shape=jax.ShapeDtypeStruct(x.shape, x.dtype),
        in_specs=[pl.BlockSpec(memory_space=pl.ANY)],
        out_specs=pl.BlockSpec(memory_space=pl.ANY),
        scratch_shapes=[pltpu.SemaphoreType.DMA],
        cost_estimate=pl.CostEstimate(
            flops=0, transcendentals=0, bytes_accessed=2 * nbytes),
    )(x)


# ----------------------------------------------------------------------------
# Forward paths
# ----------------------------------------------------------------------------
def fixed_forward(weight, _input=None):
    """Exact equivalent of Fixed.forward: identity on the embedding weight.

    No kernel launch, no HBM traffic — this is the optimal implementation of the
    module. `_input` is accepted (and ignored) to mirror the PyTorch signature.
    """
    return weight


def fixed_forward_materialized(weight, _input=None, *, force_pallas=False,
                               prefer_dma=False):
    """Variant that materializes the weight into a fresh buffer.

    - Tiny tensors (< 256 KiB) bypass Pallas entirely (XLA copy) unless forced.
    - Lane-dense shapes (K*D % 128 == 0) use a wide lane-dense tiled VMEM copy.
    - Non-lane-dense shapes (or prefer_dma=True) use a direct HBM->HBM DMA kernel.
    """
    K, D = weight.shape
    total = K * D
    nbytes = total * jnp.dtype(weight.dtype).itemsize

    if not force_pallas and nbytes <= _TINY_BYTES:
        return jnp.copy(weight)

    if prefer_dma or total % 128 != 0:
        return _hbm_to_hbm_copy(weight)

    lane = _choose_lane_width(total)
    flat = weight.reshape(total // lane, lane)   # free row-major view
    return _tiled_copy(flat).reshape(K, D)


def init_fixed_params(key, K, data_dim, dtype=jnp.float32):
    """Stand-in for torch.nn.Embedding default init (N(0, 1))."""
    return jax.random.normal(key, (K, data_dim), dtype=dtype)


if __name__ == "__main__":
    K = 8          # number of synthetic-data rows
    data_dim = 32  # feature dimension

    key = jax.random.PRNGKey(0)
    wkey, ikey = jax.random.split(key)

    # Parameter of the module (Embedding weight), deterministic init.
    weight = init_fixed_params(wkey, K, data_dim)

    # An example "input" — forward() ignores it; passed only to match the API.
    dummy_input = jax.random.randint(ikey, (2,), 0, K)

    # Fast path (what the module's forward actually is): no kernel launch.
    out_fast = jax.block_until_ready(fixed_forward(weight, dummy_input))

    # Materialized path 1: lane-dense tiled VMEM copy (force past the tiny bypass
    # so the Pallas kernel is actually exercised at this small shape).
    out_copy = jax.block_until_ready(
        fixed_forward_materialized(weight, dummy_input, force_pallas=True))

    # Materialized path 2: direct HBM->HBM DMA copy (no VMEM staging).
    out_dma = jax.block_until_ready(
        fixed_forward_materialized(weight, dummy_input, force_pallas=True,
                                   prefer_dma=True))

    # Default (non-forced) path: tiny tensor -> plain XLA copy.
    out_tiny = jax.block_until_ready(
        fixed_forward_materialized(weight, dummy_input))

    for out in (out_fast, out_copy, out_dma, out_tiny):
        assert out.shape == (K, data_dim)
        assert out.dtype == weight.dtype
        assert bool(jnp.array_equal(out, weight))

    print("KERNEL_OK")
</pallas_src>

<mosaic_0001>
module attributes {stable_mosaic.version = 11 : i64} {
  func.func @_copy_kernel(%arg0: i32, %arg1: memref<1x256xf32, #tpu.memory_space<vmem>>, %arg2: memref<1x256xf32, #tpu.memory_space<vmem>>) attributes {dimension_semantics = [#tpu.dimension_semantics<parallel>], iteration_bounds = array<i64: 1>, scalar_prefetch = 0 : i64, scratch_operands = 0 : i64, tpu.core_type = #tpu.core_type<tc>, window_params = [{transform_indices = @transform_0, window_bounds = array<i64: 1, 256>}, {transform_indices = @transform_1, window_bounds = array<i64: 1, 256>}]} {
    %c0 = arith.constant 0 : index
    %c0_0 = arith.constant 0 : index
    %0 = vector.load %arg1[%c0, %c0_0] : memref<1x256xf32, #tpu.memory_space<vmem>>, vector<1x256xf32>
    %c0_1 = arith.constant 0 : index
    %c0_2 = arith.constant 0 : index
    %1 = vector.load %arg2[%c0_1, %c0_2] : memref<1x256xf32, #tpu.memory_space<vmem>>, vector<1x256xf32>
    tpu.vector_store %arg2[%c0_1, %c0_2], %0 {strides = array<i32>} : memref<1x256xf32, #tpu.memory_space<vmem>>, vector<1x256xf32>,
    return
  }
  func.func @transform_0(%arg0: i32) -> (i32, i32) {
    %c0_i32 = arith.constant 0 : i32
    %c0_i32_0 = arith.constant 0 : i32
    return %arg0, %c0_i32 : i32, i32
  }
  func.func @transform_1(%arg0: i32) -> (i32, i32) {
    %c0_i32 = arith.constant 0 : i32
    %c0_i32_0 = arith.constant 0 : i32
    return %arg0, %c0_i32 : i32, i32
  }
}

</mosaic_0001>

<bundles_post_ra>
// kernel: tpu_custom_call.1
= control target key start
LH: loop header
LB: loop body
LE: loop exit
PB: predicated region body
PF: predicated region fallthrough
CT: control target
= control target key end

     0   :  { %6 = vsyncpa [#allocation3], 0  ;;  %s128_s0 = inlined_call_operand.hbm [shape: f32[1,256], index: 0, kind: input, shape index: {}]   ;;  %s129_s1 = inlined_call_operand.hbm [shape: f32[1,256], index: 1, kind: output, shape index: {}]  }
   0x1   :  { %7 = vsyncpa [#allocation4], 0  ;;  %s92_s6 = smov [#allocation2]   ;;  %s44_s10 = scalar_lea.hbm %s128_s0, 32 }
   0x2   :  { %s14_s7 = sshll.u32 %s92_s6, 4  ;;  %p45_p0 = scmp.ne.s32.totalorder %s128_s0, %s44_s10  ;;  %s15_s7 = int_to_ptr.vmem [resolvable:$true] %s14_s7 }
   0x3   :  { %p48_p1 = scmp.lt.u32.totalorder %s44_s10, %s128_s0 }
   0x5   :  { %p50_p2 = pnand %p48_p1, %p45_p0 }
   0x7   :  { %53 = shalt.err (!%p50_p2)
}
   0x8   :  { %s54_s15 = scalar_lea.vmem %s15_s7, 32  ;;  %p59_p4 = scmp.lt.s32.totalorder %s15_s7, %s15_s7 }
   0x9   :  { %p55_p3 = scmp.ne.s32.totalorder %s15_s7, %s54_s15  ;;  %p60_p5 = scmp.lt.s32.totalorder %s54_s15, %s54_s15 }
   0xb   :  { %p61_p6 = por %p60_p5, %p59_p4 }
   0xd   :  { %p62_p7 = pnand %p61_p6, %p55_p3 }
   0xf   :  { %65 = shalt.err (!%p62_p7)
}
  0x10   :  { %17 = dma.hbm_to_vmem [thread:$0]  %s128_s0, 32, %s15_s7, [#allocation3]  }
  0x11   :  { %88 = dma.done.wait [#allocation3], 32  }
  0x12   :  { %89 = vsyncadd [#allocation3], 4294967264  ;;  %v22_v0 = vlaneseq  ;;  %s93_s18 = smov [#allocation5]   ;;  %v21_v1 = vld [vmem:[#allocation2] sm:$0x3] }
  0x13   :  { %s33_s19 = sshll.u32 %s93_s18, 4  ;;  %s34_s19 = int_to_ptr.vmem [resolvable:$true] %s33_s19 }
  0x14   :  { %vm24_vm0 = vcmp.lt.s32.totalorder %v22_v0, 256  ;;  %s66_s20 = scalar_lea.vmem %s34_s19, 32  ;;  %p71_p9 = scmp.lt.s32.totalorder %s34_s19, %s34_s19 }
  0x15   :  { %26 = vst.msk [vmem:[#allocation5] sm:$0x3] %vm24_vm0, %v21_v1  ;;  %p67_p8 = scmp.ne.s32.totalorder %s34_s19, %s66_s20  ;;  %p72_p10 = scmp.lt.s32.totalorder %s66_s20, %s66_s20 }
  0x17   :  { %p73_p11 = por %p72_p10, %p71_p9 }
  0x19   :  { %p74_p12 = pnand %p73_p11, %p67_p8 }
  0x1b   :  { %77 = shalt.err (!%p74_p12)
}
  0x1c   :  { %s78_s0 = scalar_lea.hbm %s129_s1, 32 }
  0x1d   :  { %p79_p13 = scmp.ne.s32.totalorder %s129_s1, %s78_s0  ;;  %p82_p0 = scmp.lt.u32.totalorder %s78_s0, %s129_s1 }
  0x1f   :  { %p84_p1 = pnand %p82_p0, %p79_p13 }
  0x21   :  { %87 = shalt.err (!%p84_p1)
}
  0x22   :  { %36 = dma.vmem_to_hbm [thread:$0]  %s34_s19, 32, %s129_s1, [#allocation4]  }
  0x23   :  { %90 = dma.done.wait [#allocation4], 32  }
  0x24   :  { %91 = vsyncadd [#allocation4], 4294967264 }
  0x25   :  { %40 = vsyncpa [#allocation3], 1 }
  0x26   :  { %41 = vsyncpa [#allocation4], 1 }

</bundles_post_ra>
